<compile_context>
chip_gen: v5e
topology: v5e:2x2
jax: 0.10.0
libtpu: 0.0.40
codegen_flags: <defaults>
</compile_context>

<pallas_src>
import functools

import jax
import jax.numpy as jnp
from jax import lax
from jax.experimental import pallas as pl
from jax.experimental.pallas import tpu as pltpu


def _merge_ln_proj_kernel(xe_ref, xo_ref, we_ref, wo_ref, b_ref, o_ref, *,
                          eps, inv_4c, matmul_dtype):
    """Fused 2x2-merge + LayerNorm + Linear(4C->2C) tile.

    xe_ref/xo_ref : (tr, S, 2C)  even / odd spatial-row slabs; per token the
                    lane dim holds [x0|x2] (even) and [x1|x3] (odd).
    we_ref/wo_ref : (2C, tn)     gamma-folded weight rows for each slab.
    b_ref         : (1, tn)      beta-folded bias (f32).
    o_ref         : (tr*S, tn)   output tile.
    """
    tr, s, c2 = xe_ref.shape
    tok = tr * s

    # Layout-preserving collapse (S is a multiple of the f32 sublane count).
    xe = xe_ref[...].astype(jnp.float32).reshape(tok, c2)
    xo = xo_ref[...].astype(jnp.float32).reshape(tok, c2)

    # One-pass LayerNorm statistics over the concatenated 4C features.
    s1 = jnp.sum(xe, axis=-1, keepdims=True) + jnp.sum(xo, axis=-1, keepdims=True)
    s2 = (jnp.sum(xe * xe, axis=-1, keepdims=True)
          + jnp.sum(xo * xo, axis=-1, keepdims=True))
    mean = s1 * inv_4c
    var = s2 * inv_4c - mean * mean
    r = lax.rsqrt(var + eps)

    xne = ((xe - mean) * r).astype(matmul_dtype)
    xno = ((xo - mean) * r).astype(matmul_dtype)

    acc = jnp.dot(xne, we_ref[...], preferred_element_type=jnp.float32)
    acc = acc + jnp.dot(xno, wo_ref[...], preferred_element_type=jnp.float32)
    acc = acc + b_ref[...]
    o_ref[...] = acc.astype(o_ref.dtype)


def _pick_row_tile(n_row_groups, inner_rows, target_tokens=512):
    """Row blocks of tr*inner_rows tokens, targeting ~512 tokens per block and
    >=2 blocks (v7x dual-TC sharding + DMA/compute overlap) when possible."""
    tr = max(1, target_tokens // inner_rows)
    tr = min(tr, n_row_groups)
    if n_row_groups >= 2:
        tr = min(tr, pl.cdiv(n_row_groups, 2))
    return max(tr, 1)


def _pick_col_tile(c2, n_out, mm_bytes, budget_bytes=8 << 20):
    """Column tile for the folded weight (2 operands, default-double-buffered)."""
    tn = n_out
    while tn > 128 and 2 * 2 * c2 * tn * mm_bytes > budget_bytes:
        tn //= 2
    if tn < n_out:
        tn = max(128, (tn // 128) * 128)
    return min(tn, n_out)


def _pallas_merge(x4, w_even, w_odd, bias, out_dtype, *, eps, matmul_dtype):
    """x4: (R, 2, S, 2C) — parity axis 1 selects the even/odd slab."""
    R, two, S, C2 = x4.shape
    assert two == 2
    n_out = w_even.shape[1]
    n_tok = R * S

    tr = _pick_row_tile(R, S)
    tn = _pick_col_tile(C2, n_out, jnp.dtype(matmul_dtype).itemsize)
    grid = (pl.cdiv(R, tr), pl.cdiv(n_out, tn))

    x_bytes = jnp.dtype(x4.dtype).itemsize
    mm_bytes = jnp.dtype(matmul_dtype).itemsize
    out_bytes = jnp.dtype(out_dtype).itemsize
    # NOTE: invariant operands (weights / bias) keep the default double buffer;
    # column tiling already bounds their VMEM footprint, and the limit below
    # accounts for both copies.
    vmem_est = (2 * (tr * S * C2 * x_bytes) * 2       # even + odd x slabs
                + 2 * (C2 * tn * mm_bytes) * 2        # folded weights
                + (tn * 4) * 2                        # bias
                + (tr * S * tn * out_bytes) * 2)      # output tile
    vmem_limit = int(min(max(2 * vmem_est, 32 << 20), 64 << 20))

    kernel = functools.partial(
        _merge_ln_proj_kernel,
        eps=float(eps),
        inv_4c=1.0 / float(2 * C2),
        matmul_dtype=matmul_dtype,
    )

    y = pl.pallas_call(
        kernel,
        out_shape=jax.ShapeDtypeStruct((n_tok, n_out), out_dtype),
        grid=grid,
        in_specs=[
            # even spatial rows: [x0 | x2] per merged token
            pl.BlockSpec((tr, None, S, C2), lambda i, j: (i, 0, 0, 0)),
            # odd spatial rows:  [x1 | x3] per merged token
            pl.BlockSpec((tr, None, S, C2), lambda i, j: (i, 1, 0, 0)),
            pl.BlockSpec((C2, tn), lambda i, j: (0, j)),   # W_even (resident)
            pl.BlockSpec((C2, tn), lambda i, j: (0, j)),   # W_odd  (resident)
            pl.BlockSpec((1, tn), lambda i, j: (0, j)),    # bias   (resident)
        ],
        out_specs=pl.BlockSpec((tr * S, tn), lambda i, j: (i, j)),
        compiler_params=pltpu.CompilerParams(
            dimension_semantics=("parallel", "parallel"),
            vmem_limit_bytes=vmem_limit,
        ),
    )(x4, x4, w_even, w_odd, bias)
    return y


def patch_merging_forward(x, H, W, gamma, beta, weight, *, eps=1e-5,
                          matmul_dtype=None):
    """
    x:      (B, H*W, C)
    gamma:  (4C,)     LayerNorm weight
    beta:   (4C,)     LayerNorm bias
    weight: (2C, 4C)  nn.Linear weight (PyTorch layout, bias=False)
    matmul_dtype: dtype used on the MXU (f32 accumulation); None -> x.dtype.
    returns (y, H//2, W//2) with y: (B, H//2 * W//2, 2C)
    """
    B, L, C = x.shape
    assert L == H * W, "input feature has wrong size"
    assert H % 2 == 0 and W % 2 == 0, f"x size ({H}*{W}) are not even."
    H2, W2 = H // 2, W // 2
    C2, n_out = 2 * C, 2 * C
    n_tok = B * H2 * W2

    if matmul_dtype is None:
        matmul_dtype = x.dtype
    matmul_dtype = jnp.dtype(matmul_dtype)

    # Fold the LayerNorm affine into the projection:
    #   out = ((x - mu) * rsqrt(var+eps)) @ (gamma[:,None] * W^T) + beta @ W^T
    wT = weight.astype(jnp.float32).T                       # (4C, 2C)
    wps = gamma.astype(jnp.float32)[:, None] * wT
    w_even = jnp.concatenate([wps[0:C], wps[2 * C:3 * C]], axis=0)  # rows of x0, x2
    w_odd = jnp.concatenate([wps[C:2 * C], wps[3 * C:4 * C]], axis=0)  # rows of x1, x3
    w_even = w_even.astype(matmul_dtype)
    w_odd = w_odd.astype(matmul_dtype)
    bias = (beta.astype(jnp.float32) @ wT).reshape(1, n_out)  # stays f32

    if W2 % 8 == 0:
        # Fully fused gather: free reshape of x; the kernel streams the even /
        # odd spatial rows directly (no HBM round trip for the merged slab).
        x4 = x.reshape(B * H2, 2, W2, C2)
        y = _pallas_merge(x4, w_even, w_odd, bias, x.dtype,
                          eps=eps, matmul_dtype=matmul_dtype)
    else:
        # Fallback (W//2 not sublane-aligned, e.g. 28/14/7): materialize the
        # even/odd slabs once, pad tokens to a multiple of 8 and reuse the
        # same kernel with 8-row inner blocks.
        xr = x.reshape(B, H2, 2, W2, C2)
        even = xr[:, :, 0].reshape(n_tok, C2)
        odd = xr[:, :, 1].reshape(n_tok, C2)
        S = 8
        pad = (-n_tok) % S
        if pad:
            even = jnp.pad(even, ((0, pad), (0, 0)))
            odd = jnp.pad(odd, ((0, pad), (0, 0)))
        x4 = jnp.stack([even.reshape(-1, S, C2), odd.reshape(-1, S, C2)], axis=1)
        y = _pallas_merge(x4, w_even, w_odd, bias, x.dtype,
                          eps=eps, matmul_dtype=matmul_dtype)
        y = y[:n_tok]

    return y.reshape(B, H2 * W2, n_out), H2, W2


if __name__ == "__main__":
    # Small shapes consistent with the module: batch=2, spatial 16x16, dim=32.
    B, H, W, C = 2, 16, 16, 32

    key = jax.random.PRNGKey(0)
    kx, kg, kb, kw = jax.random.split(key, 4)
    x = jax.random.normal(kx, (B, H * W, C), dtype=jnp.float32)
    gamma = 1.0 + 0.1 * jax.random.normal(kg, (4 * C,), dtype=jnp.float32)
    beta = 0.1 * jax.random.normal(kb, (4 * C,), dtype=jnp.float32)
    weight = jax.random.normal(kw, (2 * C, 4 * C), dtype=jnp.float32) / (4 * C) ** 0.5

    # Pure-JAX reference (mirrors the PyTorch module).
    xr = x.reshape(B, H // 2, 2, W // 2, 2, C)
    x0 = xr[:, :, 0, :, 0, :]
    x1 = xr[:, :, 1, :, 0, :]
    x2 = xr[:, :, 0, :, 1, :]
    x3 = xr[:, :, 1, :, 1, :]
    xm = jnp.concatenate([x0, x1, x2, x3], -1).reshape(B, -1, 4 * C)
    mu = xm.mean(-1, keepdims=True)
    var = ((xm - mu) ** 2).mean(-1, keepdims=True)
    ref = ((xm - mu) / jnp.sqrt(var + 1e-5) * gamma + beta) @ weight.T

    # Default path: matmul runs in x.dtype (f32 here) with f32 accumulation.
    y, Ho, Wo = patch_merging_forward(x, H, W, gamma, beta, weight)
    y = jax.block_until_ready(y)
    assert y.shape == (B, (H // 2) * (W // 2), 2 * C)
    assert Ho == H // 2 and Wo == W // 2
    err_f32 = float(jnp.max(jnp.abs(y - ref)))
    assert jnp.allclose(y, ref, atol=5e-4, rtol=5e-4), err_f32

    # bf16-MXU path (f32 accumulation) — native MXU dtype on v5e/v6e/v7x.
    yb, _, _ = patch_merging_forward(x, H, W, gamma, beta, weight,
                                     matmul_dtype=jnp.bfloat16)
    yb = jax.block_until_ready(yb)
    err_bf16 = float(jnp.max(jnp.abs(yb - ref)))
    assert jnp.allclose(yb, ref, atol=4e-2, rtol=4e-2), err_bf16

    print("KERNEL_OK")
</pallas_src>

<mosaic_0001>
module attributes {stable_mosaic.version = 11 : i64} {
  func.func @_merge_ln_proj_kernel(%arg0: i32, %arg1: i32, %arg2: memref<8x1x8x64xf32, #tpu.memory_space<vmem>>, %arg3: memref<8x1x8x64xf32, #tpu.memory_space<vmem>>, %arg4: memref<64x64xf32, #tpu.memory_space<vmem>>, %arg5: memref<64x64xf32, #tpu.memory_space<vmem>>, %arg6: memref<1x64xf32, #tpu.memory_space<vmem>>, %arg7: memref<64x64xf32, #tpu.memory_space<vmem>>) attributes {dimension_semantics = [#tpu.dimension_semantics<parallel>, #tpu.dimension_semantics<parallel>], iteration_bounds = array<i64: 2, 1>, scalar_prefetch = 0 : i64, scratch_operands = 0 : i64, tpu.core_type = #tpu.core_type<tc>, window_params = [{transform_indices = @transform_0, window_bounds = array<i64: 8, 1, 8, 64>}, {transform_indices = @transform_1, window_bounds = array<i64: 8, 1, 8, 64>}, {transform_indices = @transform_2, window_bounds = array<i64: 64, 64>}, {transform_indices = @transform_3, window_bounds = array<i64: 64, 64>}, {transform_indices = @transform_4, window_bounds = array<i64: 1, 64>}, {transform_indices = @transform_5, window_bounds = array<i64: 64, 64>}]} {
    %c0 = arith.constant 0 : index
    %c0_0 = arith.constant 0 : index
    %c0_1 = arith.constant 0 : index
    %c0_2 = arith.constant 0 : index
    %0 = vector.load %arg2[%c0, %c0_0, %c0_1, %c0_2] : memref<8x1x8x64xf32, #tpu.memory_space<vmem>>, vector<8x1x8x64xf32>
    %1 = vector.shape_cast %0 : vector<8x1x8x64xf32> to vector<8x8x64xf32>
    %2 = vector.shape_cast %1 : vector<8x8x64xf32> to vector<64x64xf32>
    %c0_3 = arith.constant 0 : index
    %c0_4 = arith.constant 0 : index
    %c0_5 = arith.constant 0 : index
    %c0_6 = arith.constant 0 : index
    %3 = vector.load %arg3[%c0_3, %c0_4, %c0_5, %c0_6] : memref<8x1x8x64xf32, #tpu.memory_space<vmem>>, vector<8x1x8x64xf32>
    %4 = vector.shape_cast %3 : vector<8x1x8x64xf32> to vector<8x8x64xf32>
    %5 = vector.shape_cast %4 : vector<8x8x64xf32> to vector<64x64xf32>
    %cst = arith.constant dense<0.000000e+00> : vector<64xf32>
    %6 = vector.multi_reduction <add>, %2, %cst [1] : vector<64x64xf32> to vector<64xf32>
    %7 = vector.shape_cast %6 : vector<64xf32> to vector<64x1xf32>
    %cst_7 = arith.constant dense<0.000000e+00> : vector<64xf32>
    %8 = vector.multi_reduction <add>, %5, %cst_7 [1] : vector<64x64xf32> to vector<64xf32>
    %9 = vector.shape_cast %8 : vector<64xf32> to vector<64x1xf32>
    %10 = arith.addf %7, %9 : vector<64x1xf32>
    %11 = arith.mulf %2, %2 : vector<64x64xf32>
    %cst_8 = arith.constant dense<0.000000e+00> : vector<64xf32>
    %12 = vector.multi_reduction <add>, %11, %cst_8 [1] : vector<64x64xf32> to vector<64xf32>
    %13 = vector.shape_cast %12 : vector<64xf32> to vector<64x1xf32>
    %14 = arith.mulf %5, %5 : vector<64x64xf32>
    %cst_9 = arith.constant dense<0.000000e+00> : vector<64xf32>
    %15 = vector.multi_reduction <add>, %14, %cst_9 [1] : vector<64x64xf32> to vector<64xf32>
    %16 = vector.shape_cast %15 : vector<64xf32> to vector<64x1xf32>
    %17 = arith.addf %13, %16 : vector<64x1xf32>
    %cst_10 = arith.constant 7.812500e-03 : f32
    %18 = vector.broadcast %cst_10 : f32 to vector<64x1xf32>
    %19 = arith.mulf %10, %18 : vector<64x1xf32>
    %cst_11 = arith.constant 7.812500e-03 : f32
    %20 = vector.broadcast %cst_11 : f32 to vector<64x1xf32>
    %21 = arith.mulf %17, %20 : vector<64x1xf32>
    %22 = arith.mulf %19, %19 : vector<64x1xf32>
    %23 = arith.subf %21, %22 : vector<64x1xf32>
    %cst_12 = arith.constant 9.99999974E-6 : f32
    %24 = vector.broadcast %cst_12 : f32 to vector<64x1xf32>
    %25 = arith.addf %23, %24 : vector<64x1xf32>
    %26 = math.rsqrt %25 : vector<64x1xf32>
    %27 = vector.broadcast %19 : vector<64x1xf32> to vector<64x64xf32>
    %28 = arith.subf %2, %27 : vector<64x64xf32>
    %29 = vector.broadcast %26 : vector<64x1xf32> to vector<64x64xf32>
    %30 = arith.mulf %28, %29 : vector<64x64xf32>
    %31 = vector.broadcast %19 : vector<64x1xf32> to vector<64x64xf32>
    %32 = arith.subf %5, %31 : vector<64x64xf32>
    %33 = vector.broadcast %26 : vector<64x1xf32> to vector<64x64xf32>
    %34 = arith.mulf %32, %33 : vector<64x64xf32>
    %c0_13 = arith.constant 0 : index
    %c0_14 = arith.constant 0 : index
    %35 = vector.load %arg4[%c0_13, %c0_14] : memref<64x64xf32, #tpu.memory_space<vmem>>, vector<64x64xf32>
    %cst_15 = arith.constant dense<0.000000e+00> : vector<64x64xf32>
    %36 = tpu.matmul %30, %35, %cst_15 {dimension_numbers = #tpu.dot_dimension_numbers<[1], [0], [0], [1], [0, 0, 1, 1], [], []>} : vector<64x64xf32>, vector<64x64xf32>, vector<64x64xf32> -> vector<64x64xf32>
    %c0_16 = arith.constant 0 : index
    %c0_17 = arith.constant 0 : index
    %37 = vector.load %arg5[%c0_16, %c0_17] : memref<64x64xf32, #tpu.memory_space<vmem>>, vector<64x64xf32>
    %cst_18 = arith.constant dense<0.000000e+00> : vector<64x64xf32>
    %38 = tpu.matmul %34, %37, %cst_18 {dimension_numbers = #tpu.dot_dimension_numbers<[1], [0], [0], [1], [0, 0, 1, 1], [], []>} : vector<64x64xf32>, vector<64x64xf32>, vector<64x64xf32> -> vector<64x64xf32>
    %39 = arith.addf %36, %38 : vector<64x64xf32>
    %c0_19 = arith.constant 0 : index
    %c0_20 = arith.constant 0 : index
    %40 = vector.load %arg6[%c0_19, %c0_20] : memref<1x64xf32, #tpu.memory_space<vmem>>, vector<1x64xf32>
    %41 = vector.broadcast %40 : vector<1x64xf32> to vector<64x64xf32>
    %42 = arith.addf %39, %41 : vector<64x64xf32>
    %c0_21 = arith.constant 0 : index
    %c0_22 = arith.constant 0 : index
    %43 = vector.load %arg7[%c0_21, %c0_22] : memref<64x64xf32, #tpu.memory_space<vmem>>, vector<64x64xf32>
    tpu.vector_store %arg7[%c0_21, %c0_22], %42 {strides = array<i32>} : memref<64x64xf32, #tpu.memory_space<vmem>>, vector<64x64xf32>,
    return
  }
  func.func @transform_0(%arg0: i32, %arg1: i32) -> (i32, i32, i32, i32) {
    %c0_i32 = arith.constant 0 : i32
    %c0_i32_0 = arith.constant 0 : i32
    %c0_i32_1 = arith.constant 0 : i32
    %c0_i32_2 = arith.constant 0 : i32
    return %arg0, %c0_i32, %c0_i32_0, %c0_i32_1 : i32, i32, i32, i32
  }
  func.func @transform_1(%arg0: i32, %arg1: i32) -> (i32, i32, i32, i32) {
    %c1_i32 = arith.constant 1 : i32
    %c0_i32 = arith.constant 0 : i32
    %c0_i32_0 = arith.constant 0 : i32
    %c0_i32_1 = arith.constant 0 : i32
    return %arg0, %c1_i32, %c0_i32, %c0_i32_0 : i32, i32, i32, i32
  }
  func.func @transform_2(%arg0: i32, %arg1: i32) -> (i32, i32) {
    %c0_i32 = arith.constant 0 : i32
    %c0_i32_0 = arith.constant 0 : i32
    return %c0_i32, %arg1 : i32, i32
  }
  func.func @transform_3(%arg0: i32, %arg1: i32) -> (i32, i32) {
    %c0_i32 = arith.constant 0 : i32
    %c0_i32_0 = arith.constant 0 : i32
    return %c0_i32, %arg1 : i32, i32
  }
  func.func @transform_4(%arg0: i32, %arg1: i32) -> (i32, i32) {
    %c0_i32 = arith.constant 0 : i32
    %c0_i32_0 = arith.constant 0 : i32
    return %c0_i32, %arg1 : i32, i32
  }
  func.func @transform_5(%arg0: i32, %arg1: i32) -> (i32, i32) {
    %c0_i32 = arith.constant 0 : i32
    return %arg0, %arg1 : i32, i32
  }
}

</mosaic_0001>

<bundles_post_ra>
// kernel: tpu_custom_call.1
= control target key start
LH: loop header
LB: loop body
LE: loop exit
PB: predicated region body
PF: predicated region fallthrough
CT: control target
= control target key end

     0   :  { %s1726_s0 = inlined_call_operand.hbm [shape: f32[16,2,8,64], index: 0, kind: input, shape index: {}]   ;;  %s1727_s1 = inlined_call_operand.hbm [shape: f32[16,2,8,64], index: 1, kind: input, shape index: {}]   ;;  %s1728_s2 = inlined_call_operand.hbm [shape: f32[64,64], index: 2, kind: input, shape index: {}]   ;;  %s1729_s3 = inlined_call_operand.hbm [shape: f32[64,64], index: 3, kind: input, shape index: {}]   ;;  %s1730_s4 = inlined_call_operand.vmem [shape: f32[1,64], index: 4, kind: input, shape index: {}]   ;;  %s1731_s5 = inlined_call_operand.vmem [shape: f32[128,64], index: 5, kind: output, shape index: {}]  }
   0x1   :  { %1738 = sst [smem:[#allocation14_spill]] %s1726_s0 }
   0x2   :  { %1739 = sst [smem:[#allocation15_spill]] %s1728_s2 }
   0x3   :  { %1740 = sst [smem:[#allocation16_spill]] %s1729_s3 }
   0x4   :  { %10 = vsyncpa [#allocation3], 0 }
   0x5   :  { %12 = vsyncpa [#allocation3 + $0x1], 0 }
   0x6   :  { %13 = vsyncpa [#allocation5], 0 }
   0x7   :  { %15 = vsyncpa [#allocation5 + $0x1], 0 }
   0x8   :  { %16 = vsyncpa [#allocation8], 0  ;;  %s1363_s18 = smov 0   ;;  %s1365_s19 = smov 0  }
   0x9   :  { %s1367_s20 = smov 0   ;;  %s1369_s21 = smov 0  }
   0xa   :  { %s1371_s22 = smov 0   ;;  %s1373_s23 = smov 0  }
   0xb LB: > { %s1732_s24 = sadd.s32 4294967295, %s1326_s23   ;;  %p54_p0 = scmp.ne.s32.totalorder %s1310_s19, %s1306_s18  ;;  %s1326_s23 = sphi %s1373_s23, %s22_s23   ;;  %s1322_s22 = sphi %s1371_s22, %s1757_s22   ;;  %s1318_s21 = sphi %s1369_s21, %s1756_s21   ;;  %s1314_s20 = sphi %s1367_s20, %s1755_s20   ;;  %s1310_s19 = sphi %s1365_s19, %s1754_s19   ;;  %s1306_s18 = sphi %s1363_s18, %s1753_s18  }
   0xc   : > { %p1395_p1 = scmp.eq.s32.totalorder %s1732_s24, 0  ;;  %p987_p2 = scmp.ge.s32.totalorder %s1326_s23, 1 }
   0xd   : > { %p197_p3 = scmp.lt.s32.totalorder %s1326_s23, 3  ;;  %s1743_s2 = sld [smem:[#allocation15_spill]] }
   0xe   : > { %p1403_p4 = por %p1395_p1, %p54_p0  ;;  %s1328_s6 = smov [#allocation6]  }
   0xf   : > { %p1410_p5 = pnand %p987_p2, %p197_p3  ;;  %s212_s7 = sshll.u32 %s1328_s6, 4  ;;  %s213_s7 = int_to_ptr.vmem [resolvable:$true] %s212_s7 }
  0x10   : > { %s1745_s3 = sld [smem:[#allocation16_spill]]  ;;  %s1733_s11 = smov 128  }
  0x11   : > { %p1055_p6 = pneg %p1410_p5  ;;  %s1735_s12 = smov 8  }
  0x12   : > { %s1331_s13 = smov [#allocation7]   ;;  %s34_s15 = sadd.s32 1, %s1322_s22 }
  0x13   : > { %s210_s29 = sshll.u32 %s1743_s2, 4  ;;  %p1056_p7 = pnand %p1055_p6, %p1395_p1  ;;  %s211_s29 = int_to_ptr.hbm [resolvable:$true] %s210_s29 }
  0x14   : > { %s228_s14 = sshll.u32 %s1331_s13, 4  ;;  %s41_s16 = sadd.s32 1, %s1314_s20  ;;  %s229_s14 = int_to_ptr.vmem [resolvable:$true] %s228_s14 }
  0x15   : > { %1058 = dma.hbm_to_vmem [thread:$0]  (!%p1056_p7), %s211_s29, 1024, %s213_s7, [#allocation5], %s1733_s11, %s1733_s11, %s1735_s12  }
  0x16   : > { %s226_s10 = sshll.u32 %s1745_s3, 4  ;;  %p36_p8 = scmp.ge.s32.totalorder %s34_s15, 2  ;;  %s227_s10 = int_to_ptr.hbm [resolvable:$true] %s226_s10 }
  0x17   : > { %1061 = dma.hbm_to_vmem [thread:$0]  (!%p1056_p7), %s227_s10, 1024, %s229_s14, [#allocation8], %s1733_s11, %s1733_s11, %s1735_s12  }
  0x18   : > { %p48_p9 = scmp.ne.s32.totalorder %s1314_s20, %s1310_s19  ;;  %p49_p10 = scmp.eq.s32.totalorder %s1326_s23, 0 }
  0x19   : > { %p1071_p11 = scmp.lt.s32.totalorder %s1326_s23, 2  ;;  %s1759_s15 = smov (%p36_p8, %s34_s15), 0 }
  0x1a   : > { %1746 = sst [smem:[#allocation13_spill]] %s1759_s15  ;;  %p1435_p12 = por %p49_p10, %p48_p9 }
  0x1b   : > { %s248_s18 = sand.u32 1, %s1314_s20   ;;  %s38_s27 = ssub.s32 %s1322_s22, %s1759_s15 }
  0x1c   : > { %p39_p13 = scmp.eq.s32.totalorder %s38_s27, 0  ;;  %s992_s28 = sshll.u32 %s248_s18, 6 }
  0x1d   : > { %s1025_s29 = sshll.u32 %s1322_s22, 7  ;;  %s1748_s0 = sld [smem:[#allocation14_spill]] }
  0x1e   : > { %s1444_s6 = scalar_select %p39_p13, %s1314_s20, %s41_s16  }
  0x1f   : > { %s252_s10 = scalar_lea.vmem [#allocation2], %s992_s28  ;;  %p1063_p0 = pnand %p1071_p11, %p1435_p12 }
  0x20   : > { %s261_s13 = sshll.u32 %s252_s10, 4  ;;  %s889_s27 = scalar_lea.hbm %s1727_s1, %s1025_s29  ;;  %s262_s13 = int_to_ptr.vmem [resolvable:$true] %s261_s13 }
  0x21   : > { %s249_s12 = scalar_lea.sflag [#allocation3], %s248_s18  ;;  %s1332_s16 = smov 256  }
  0x22   : > { %s1749_s2 = smov 8   ;;  %s1750_s3 = smov 128  }
  0x23   : > { %s258_s9 = scalar_lea.hbm %s1748_s0, %s1025_s29  ;;  %s890_s7 = scalar_lea.hbm %s889_s27, 8 }
  0x24   : > { %s259_s14 = sshll.u32 %s258_s9, 4  ;;  %s275_s8 = scalar_lea.vmem [#allocation4], %s992_s28  ;;  %s260_s14 = int_to_ptr.hbm [resolvable:$true] %s259_s14 }
  0x25   : > { %1065 = dma.hbm_to_vmem [thread:$0]  (!%p1063_p0), %s260_s14, 1024, %s262_s13, %s249_s12, %s1332_s16, %s1750_s3, %s1749_s2  }
  0x26   : > { %s285_s0 = sshll.u32 %s275_s8, 4  ;;  %s283_s15 = sshll.u32 %s890_s7, 4  ;;  %s286_s0 = int_to_ptr.vmem [resolvable:$true] %s285_s0  ;;  %s284_s15 = int_to_ptr.hbm [resolvable:$true] %s283_s15 }
  0x27   : > { %s271_s9 = sand.u32 1, %s1326_s23   ;;  %297 = sbr.rel (%p1410_p5) target bundleno = 412 (0x19c), region = 40 }
  0x28   : > { %s272_s10 = scalar_lea.sflag [#allocation5], %s271_s9  ;;  %s299_s24 = sand.u32 (!%p1410_p5), 1, %s1310_s19  }
  0x29   : > { %1068 = dma.hbm_to_vmem [thread:$0]  (!%p1063_p0), %s284_s15, 1024, %s286_s0, %s272_s10, %s1332_s16, %s1750_s3, %s1749_s2  }
  0x2a   : > { %s1000_s11 = sshll.u32 (!%p1410_p5), %s299_s24, 6  ;;  %s300_s17 = scalar_lea.sflag (!%p1410_p5), [#allocation3], %s299_s24 }
  0x2b   : > { %s1464_s12 = scalar_lea.vmem (!%p1410_p5), [#allocation2], %s1000_s11 }
  0x2c   : > { %1289 = dma.done.wait (%p1403_p4), %s300_s17, 1024  }
  0x2d   : > { %1291 = vsyncadd (%p1403_p4), %s300_s17, 4294966272  ;;  %s1751_s18 = sadd.s32 4294967295, %s1326_s23   ;;  %s1472_s2 = scalar_lea.vmem [#allocation4], %s1000_s11 }
  0x2e   : > { %s309_s28 = sand.u32 1, %s1751_s18  }
  0x2f   : > { %s310_s0 = scalar_lea.sflag [#allocation5], %s309_s28 }
  0x30   : > { %1293 = dma.done.wait (%p1403_p4), %s310_s0, 1024  }
  0x31   : > { %1295 = vsyncadd (%p1403_p4), %s310_s0, 4294966272 }
  0x32   : > { %1297 = dma.done.wait (%p1395_p1), [#allocation5], 1024  }
  0x33   : > { %1299 = vsyncadd (%p1395_p1), [#allocation5], 4294966272 }
  0x34   : > { %1301 = dma.done.wait (%p1395_p1), [#allocation8], 1024  }
  0x35   : > { %1303 = vsyncadd (%p1395_p1), [#allocation8], 4294966272  ;;  %vm392_vm0 = vcmask 523264   ;;  %v1487_v0 = vld [vmem:[%s1464_s12 + $0x20] sm:$0xff]  ;;  %v1515_v13 = vld [vmem:[%s1464_s12 + $0x28] sm:$0xff]  ;;  %s1004_s3 = sshll.u32 %s1318_s21, 3 }
  0x36   : > { %v1490_v1 = vld [vmem:[%s1464_s12] sm:$0xff]  ;;  %v405_v2 = vsel %vm392_vm0, %v1487_v0, 0.0  ;;  %v453_v4 = vmul.f32 %v1487_v0, %v1487_v0  ;;  %v1518_v14 = vld [vmem:[%s1472_s2 + $0x28] sm:$0xff]  ;;  %v408_v15 = vsel %vm392_vm0, %v1515_v13, 0.0  ;;  %v454_v20 = vmul.f32 %v1515_v13, %v1515_v13  ;;  %v1538_v25 = vld [vmem:[%s1464_s12 + $0x30] sm:$0xff]  ;;  %p368_p1 = scmp.lt.s32.totalorder %s1004_s3, 15 }
  0x37   : > { %v393_v3 = vsel %vm392_vm0, %v1490_v1, 0.0  ;;  %406 = vadd.xlane.f32.xlu0 %v405_v2  ;;  %v1499_v5 = vld [vmem:[%s1472_s2 + $0x20] sm:$0xff]  ;;  %v449_v12 = vmul.f32 %v1490_v1, %v1490_v1  ;;  %v432_v17 = vsel %vm392_vm0, %v1518_v14, 0.0  ;;  %v486_v19 = vmul.f32 %v1518_v14, %v1518_v14  ;;  %v1535_v24 = vld [vmem:[%s1464_s12 + $0x8] sm:$0xff]  ;;  %v1552_v31 = vld [vmem:[%s1472_s2 + $0x30] sm:$0xff] }
  0x38   : > { %394 = vadd.xlane.f32.xlu2 %v393_v3  ;;  %v469_v6 = vsel %vm392_vm0, %v453_v4, 0.0  ;;  %v1503_v7 = vld [vmem:[%s1472_s2] sm:$0xff]  ;;  %v485_v8 = vmul.f32 %v1499_v5, %v1499_v5  ;;  %v429_v9 = vsel %vm392_vm0, %v1499_v5, 0.0  ;;  %v472_v23 = vsel %vm392_vm0, %v454_v20, 0.0  ;;  %v1541_v26 = vld [vmem:[%s1472_s2 + $0x8] sm:$0xff]  ;;  %v1563_v37 = vld [vmem:[%s1464_s12 + $0x10] sm:$0xff] }
  0x39   : > { %470 = vadd.xlane.f32.xlu1 %v469_v6  ;;  %v417_v10 = vsel %vm392_vm0, %v1503_v7, 0.0  ;;  %v457_v16 = vsel %vm392_vm0, %v449_v12, 0.0  ;;  %v481_v18 = vmul.f32 %v1503_v7, %v1503_v7  ;;  %v504_v22 = vsel %vm392_vm0, %v486_v19, 0.0  ;;  %v1572_v42 = vld [vmem:[%s1472_s2 + $0x10] sm:$0xff]  ;;  %v1575_v43 = vld [vmem:[%s1472_s2 + $0x38] sm:$0xff]  ;;  %s1761_s3 = smov (!%p368_p1, %s1004_s3), 15 }
  0x3a   : > { %v501_v11 = vsel %vm392_vm0, %v485_v8, 0.0  ;;  %v396_v27 = vsel %vm392_vm0, %v1535_v24, 0.0  ;;  %v411_v28 = vsel %vm392_vm0, %v1538_v25, 0.0  ;;  %v420_v29 = vsel %vm392_vm0, %v1541_v26, 0.0  ;;  %v1578_v44 = vld [vmem:[%s1464_s12 + $0x38] sm:$0xff]  ;;  %v687_v4 = vld [vmem:[#allocation7 + $0x30] sm:$0xff] }
  0x3b   : > { %v489_v21 = vsel %vm392_vm0, %v481_v18, 0.0  ;;  %v482_v30 = vmul.f32 %v1541_v26, %v1541_v26  ;;  %v450_v32 = vmul.f32 %v1535_v24, %v1535_v24  ;;  %v435_v33 = vsel %vm392_vm0, %v1552_v31, 0.0  ;;  %v1598_v55 = vld [vmem:[%s1472_s2 + $0x18] sm:$0xff]  ;;  %v679_v6 = vld [vmem:[#allocation6 + $0x30] sm:$0xff]  ;;  %v686_v8 = vld [vmem:[#allocation7 + $0x28] sm:$0xff]  ;;  %s1005_s25 = sshll.u32 %s1761_s3, 3 }
  0x3c   : > { %v455_v36 = vmul.f32 %v1538_v25, %v1538_v25  ;;  %v487_v38 = vmul.f32 %v1552_v31, %v1552_v31  ;;  %v399_v40 = vsel %vm392_vm0, %v1563_v37, 0.0  ;;  %v423_v45 = vsel %vm392_vm0, %v1572_v42, 0.0  ;;  %v1601_v56 = vld [vmem:[%s1464_s12 + $0x18] sm:$0xff]  ;;  %v683_v19 = vld [vmem:[#allocation7 + $0x10] sm:$0xff]  ;;  %s1690_s13 = scalar_lea.vmem %s1731_s5, %s1005_s25 }
  0x3d   : > { %v492_v34 = vsel %vm392_vm0, %v482_v30, 0.0  ;;  %v460_v35 = vsel %vm392_vm0, %v450_v32, 0.0  ;;  %v438_v46 = vsel %vm392_vm0, %v1575_v43, 0.0  ;;  %v414_v47 = vsel %vm392_vm0, %v1578_v44, 0.0  ;;  %v688_v2 = vld [vmem:[#allocation7 + $0x38] sm:$0xff]  ;;  %v675_v20 = vld [vmem:[#allocation6 + $0x10] sm:$0xff] }
  0x3e   : > { %v475_v39 = vsel %vm392_vm0, %v455_v36, 0.0  ;;  %v507_v41 = vsel %vm392_vm0, %v487_v38, 0.0  ;;  %v451_v48 = vmul.f32 %v1563_v37, %v1563_v37  ;;  %v456_v49 = vmul.f32 %v1578_v44, %v1578_v44  ;;  %v680_v3 = vld [vmem:[#allocation6 + $0x38] sm:$0xff]  ;;  %1027 = vmatpush.msra.mxu2 %v688_v2  ;;  %721 = vmatpush.msra.mxu0 %v688_v2 }
  0x3f   : > { %430 = vadd.xlane.f32.xlu0 %v429_v9  ;;  %v483_v50 = vmul.f32 %v1572_v42, %v1572_v42  ;;  %v488_v54 = vmul.f32 %v1575_v43, %v1575_v43  ;;  %v426_v58 = vsel %vm392_vm0, %v1598_v55, 0.0  ;;  %v402_v59 = vsel %vm392_vm0, %v1601_v56, 0.0  ;;  %1035 = vmatpush.msra.mxu3 %v680_v3  ;;  %v678_v9 = vld [vmem:[#allocation6 + $0x28] sm:$0xff] }
  0x40   : > { %418 = vadd.xlane.f32.xlu2 %v417_v10  ;;  %v463_v51 = vsel %vm392_vm0, %v451_v48, 0.0  ;;  %v478_v52 = vsel %vm392_vm0, %v456_v49, 0.0  ;;  %v452_v60 = vmul.f32 %v1601_v56, %v1601_v56  ;;  %v484_v61 = vmul.f32 %v1598_v55, %v1598_v55  ;;  %786 = vmatpush.msra.mxu1 %v680_v3  ;;  %v685_v10 = vld [vmem:[#allocation7 + $0x20] sm:$0xff] }
  0x41   : > { %502 = vadd.xlane.f32.xlu1 %v501_v11  ;;  %v495_v53 = vsel %vm392_vm0, %v483_v50, 0.0  ;;  %v510_v57 = vsel %vm392_vm0, %v488_v54, 0.0  ;;  %1028 = vmatpush.msra.mxu2 %v687_v4  ;;  %v677_v11 = vld [vmem:[#allocation6 + $0x20] sm:$0xff] }
  0x42   : > { %v466_v62 = vsel %vm392_vm0, %v452_v60, 0.0  ;;  %v498_v63 = vsel %vm392_vm0, %v484_v61, 0.0  ;;  %1036 = vmatpush.msra.mxu3 %v679_v6  ;;  %722 = vmatpush.msra.mxu0 %v687_v4 }
  0x43   : > { %787 = vmatpush.msra.mxu1 %v679_v6  ;;  %1029 = vmatpush.msra.mxu2 %v686_v8 }
  0x44   : > { %1037 = vmatpush.msra.mxu3 %v678_v9  ;;  %723 = vmatpush.msra.mxu0 %v686_v8 }
  0x45   : > { %788 = vmatpush.msra.mxu1 %v678_v9  ;;  %1030 = vmatpush.msra.mxu2 %v685_v10 }
  0x46   : > { %1038 = vmatpush.msra.mxu3 %v677_v11  ;;  %724 = vmatpush.msra.mxu0 %v685_v10 }
  0x47   : > { %409 = vadd.xlane.f32.xlu0 %v408_v15  ;;  %789 = vmatpush.msra.mxu1 %v677_v11 }
  0x48   : > { %458 = vadd.xlane.f32.xlu2 %v457_v16  ;;  %v684_v16 = vld [vmem:[#allocation7 + $0x18] sm:$0xff] }
  0x49   : > { %433 = vadd.xlane.f32.xlu1 %v432_v17  ;;  %v676_v17 = vld [vmem:[#allocation6 + $0x18] sm:$0xff]  ;;  %1031 = vmatpush.msra.mxu2 %v684_v16 }
  0x4a   : > { %1039 = vmatpush.msra.mxu3 %v676_v17  ;;  %725 = vmatpush.msra.mxu0 %v684_v16 }
  0x4b   : > { %790 = vmatpush.msra.mxu1 %v676_v17  ;;  %1032 = vmatpush.msra.mxu2 %v683_v19 }
  0x4c   : > { %1040 = vmatpush.msra.mxu3 %v675_v20  ;;  %726 = vmatpush.msra.mxu0 %v683_v19 }
  0x4d   : > { %791 = vmatpush.msra.mxu1 %v675_v20 }
  0x4f   : > { %490 = vadd.xlane.f32.xlu0 %v489_v21  ;;  %v682_v21 = vld [vmem:[#allocation7 + $0x8] sm:$0xff] }
  0x50   : > { %505 = vadd.xlane.f32.xlu2 %v504_v22  ;;  %v674_v22 = vld [vmem:[#allocation6 + $0x8] sm:$0xff]  ;;  %1033 = vmatpush.msra.mxu2 %v682_v21 }
  0x51   : > { %473 = vadd.xlane.f32.xlu1 %v472_v23  ;;  %1041 = vmatpush.msra.mxu3 %v674_v22  ;;  %v681_v23 = vld [vmem:[#allocation7] sm:$0xff] }
  0x52   : > { %727 = vmatpush.msra.mxu0 %v682_v21  ;;  %792 = vmatpush.msra.mxu1 %v674_v22 }
  0x53   : > { %1034 = vmatpush.msra.mxu2 %v681_v23 }
  0x54   : > { %728 = vmatpush.msra.mxu0 %v681_v23 }
  0x57   : > { %397 = vadd.xlane.f32.xlu0 %v396_v27  ;;  %v673_v27 = vld [vmem:[#allocation6] sm:$0xff] }
  0x58   : > { %412 = vadd.xlane.f32.xlu2 %v411_v28  ;;  %1042 = vmatpush.msra.mxu3 %v673_v27 }
  0x59   : > { %421 = vadd.xlane.f32.xlu1 %v420_v29  ;;  %793 = vmatpush.msra.mxu1 %v673_v27 }
  0x5f   : > { %436 = vadd.xlane.f32.xlu0 %v435_v33 }
  0x60   : > { %493 = vadd.xlane.f32.xlu2 %v492_v34 }
  0x61   : > { %461 = vadd.xlane.f32.xlu1 %v460_v35 }
  0x67   : > { %476 = vadd.xlane.f32.xlu0 %v475_v39 }
  0x68   : > { %400 = vadd.xlane.f32.xlu2 %v399_v40 }
  0x69   : > { %508 = vadd.xlane.f32.xlu1 %v507_v41 }
  0x6f   : > { %424 = vadd.xlane.f32.xlu0 %v423_v45 }
  0x70   : > { %439 = vadd.xlane.f32.xlu2 %v438_v46 }
  0x71   : > { %415 = vadd.xlane.f32.xlu1 %v414_v47 }
  0x77   : > { %464 = vadd.xlane.f32.xlu0 %v463_v51 }
  0x78   : > { %479 = vadd.xlane.f32.xlu2 %v478_v52 }
  0x79   : > { %496 = vadd.xlane.f32.xlu1 %v495_v53 }
  0x7f   : > { %511 = vadd.xlane.f32.xlu0 %v510_v57 }
  0x80   : > { %427 = vadd.xlane.f32.xlu2 %v426_v58 }
  0x81   : > { %403 = vadd.xlane.f32.xlu1 %v402_v59 }
  0x87   : > { %467 = vadd.xlane.f32.xlu0 %v466_v62 }
  0x89   : > { %499 = vadd.xlane.f32.xlu1 %v498_v63 }
  0xaa   : > { %v407_v12 = vpop.xlane.xlu0 %406 }
  0xab   : > { %v395_v15 = vpop.xlane.xlu2 %394 }
  0xac   : > { %v471_v18 = vpop.xlane.xlu1 %470 }
  0xb2   : > { %v431_v28 = vpop.xlane.xlu0 %430 }
  0xb3   : > { %v419_v29 = vpop.xlane.xlu2 %418  ;;  %v445_v30 = vadd.f32 %v431_v28, %v407_v12 }
  0xb4   : > { %v503_v32 = vpop.xlane.xlu1 %502  ;;  %v441_v46 = vadd.f32 %v419_v29, %v395_v15 }
  0xb5   : > { %v525_v33 = vmul.f32 0.0078125, %v445_v30  ;;  %v517_v34 = vadd.f32 %v503_v32, %v471_v18 }
  0xb6   : > { %v1614_v48 = vmul.f32 0.0078125, %v441_v46 }
  0xb7   : > { %v533_v35 = vmul.f32 0.0078125, %v517_v34  ;;  %v541_v36 = vmul.f32 %v525_v33, %v525_v33  ;;  %v645_v16 = vsub.f32 %v1487_v0, %v525_v33  ;;  %v661_v17 = vsub.f32 %v1499_v5, %v525_v33 }
  0xb8   : > { %v537_v59 = vmul.f32 %v1614_v48, %v1614_v48 }
  0xb9   : > { %v549_v38 = vsub.f32 %v533_v35, %v541_v36 }
  0xba   : > { %v410_v39 = vpop.xlane.xlu0 %409 }
  0xbb   : > { %v459_v40 = vpop.xlane.xlu2 %458  ;;  %v557_v41 = vadd.f32 1e-05, %v549_v38 }
  0xbc   : > { %v434_v45 = vpop.xlane.xlu1 %433 }
  0xbd   : > { %1128 = vrsqrt.f32 %v557_v41  ;;  %v446_v47 = vadd.f32 %v434_v45, %v410_v39  ;;  %vm607_vm2 = vweird.f32 %v557_v41 }
  0xbf   : > { %v1616_v51 = vmul.f32 0.0078125, %v446_v47 }
  0xc1   : > { %v542_v63 = vmul.f32 %v1616_v51, %v1616_v51 }
  0xc2   : > { %v491_v49 = vpop.xlane.xlu0 %490 }
  0xc3   : > { %v506_v50 = vpop.xlane.xlu2 %505  ;;  %v513_v52 = vadd.f32 %v491_v49, %v459_v40  ;;  %v1129_v53 = vpop.eup %1128 }
  0xc4   : > { %v474_v54 = vpop.xlane.xlu1 %473  ;;  %v602_v57 = vmul.f32 %v1129_v53, %v557_v41  ;;  %vm608_vm1 = vweird.f32 %v1129_v53 }
  0xc5   : > { %v529_v58 = vmul.f32 0.0078125, %v513_v52  ;;  %v518_v60 = vadd.f32 %v506_v50, %v474_v54  ;;  %vm609_vm3 = vmor %vm607_vm2, %vm608_vm1  ;;  %v641_v52 = vsub.f32 %v1490_v1, %v1614_v48 }
  0xc6   : > { %v603_v61 = vmul.f32 %v1129_v53, %v602_v57 }
  0xc7   : > { %v545_v62 = vsub.f32 %v529_v58, %v537_v59  ;;  %v534_v2 = vmul.f32 0.0078125, %v518_v60  ;;  %v646_v58 = vsub.f32 %v1515_v13, %v1616_v51 }
  0xc8   : > { %v604_v3 = vmul.f32 0.5, %v603_v61 }
  0xc9   : > { %v553_v4 = vadd.f32 1e-05, %v545_v62  ;;  %v550_v6 = vsub.f32 %v534_v2, %v542_v63  ;;  %v662_v62 = vsub.f32 %v1518_v14, %v1616_v51 }
  0xca   : > { %v398_v8 = vpop.xlane.xlu0 %397  ;;  %v605_v10 = vsub.f32 1.5, %v604_v3 }
  0xcb   : > { %v413_v9 = vpop.xlane.xlu2 %412  ;;  %1130 = vrsqrt.f32 %v553_v4  ;;  %v558_v11 = vadd.f32 1e-05, %v550_v6  ;;  %vm567_vm5 = vweird.f32 %v553_v4 }
  0xcc   : > { %v422_v12 = vpop.xlane.xlu1 %421  ;;  %v606_v15 = vmul.f32 %v1129_v53, %v605_v10 }
  0xcd   : > { %1132 = vrsqrt.f32 %v558_v11  ;;  %v442_v18 = vadd.f32 %v422_v12, %v398_v8  ;;  %vm617_vm8 = vweird.f32 %v558_v11 }
  0xce   : > { %v610_v19 = vsel %vm609_vm3, %v1129_v53, %v606_v15  ;;  %v657_v53 = vsub.f32 %v1503_v7, %v1614_v48 }
  0xcf   : > { %v669_v20 = vmul.f32 %v661_v17, %v610_v19  ;;  %v653_v21 = vmul.f32 %v645_v16, %v610_v19  ;;  %v1626_v30 = vmul.f32 0.0078125, %v442_v18 }
  0xd1   : > { %v1131_v22 = vpop.eup %1130  ;;  %1010 = vmatmul.msk.f32.vlgmr.msra.gmra.mxu2 %vm392_vm0, %v669_v20  ;;  %1018 = vmatmul.msk.f32.vlgmr.msra.gmra.mxu3 %vm392_vm0, %v653_v21  ;;  %v538_v38 = vmul.f32 %v1626_v30, %v1626_v30 }
  0xd2   : > { %v562_v23 = vmul.f32 %v1131_v22, %v553_v4  ;;  %v437_v27 = vpop.xlane.xlu0 %436  ;;  %vm568_vm4 = vweird.f32 %v1131_v22 }
  0xd3   : > { %v494_v28 = vpop.xlane.xlu2 %493  ;;  %v1133_v29 = vpop.eup %1132  ;;  %v447_v36 = vadd.f32 %v437_v27, %v413_v9  ;;  %vm569_vm7 = vmor %vm567_vm5, %vm568_vm4 }
  0xd4   : > { %v563_v32 = vmul.f32 %v1131_v22, %v562_v23  ;;  %v612_v0 = vmul.f32 %v1133_v29, %v558_v11  ;;  %v462_v34 = vpop.xlane.xlu1 %461  ;;  %vm618_vm6 = vweird.f32 %v1133_v29 }
  0xd5   : > { %v514_v5 = vadd.f32 %v494_v28, %v462_v34  ;;  %v1634_v54 = vmul.f32 0.0078125, %v447_v36  ;;  %vm619_vm9 = vmor %vm617_vm8, %vm618_vm6  ;;  %v642_v28 = vsub.f32 %v1535_v24, %v1626_v30 }
  0xd6   : > { %v564_v33 = vmul.f32 0.5, %v563_v32  ;;  %v613_v35 = vmul.f32 %v1133_v29, %v612_v0 }
  0xd7   : > { %v530_v39 = vmul.f32 0.0078125, %v514_v5  ;;  %v543_v3 = vmul.f32 %v1634_v54, %v1634_v54 }
  0xd8   : > { %v565_v40 = vsub.f32 1.5, %v564_v33  ;;  %v614_v41 = vmul.f32 0.5, %v613_v35 }
  0xd9   : > { %v546_v45 = vsub.f32 %v530_v39, %v538_v38 }
  0xda   : > { %v615_v46 = vsub.f32 1.5, %v614_v41  ;;  %v477_v47 = vpop.xlane.xlu0 %476  ;;  %v566_v50 = vmul.f32 %v1131_v22, %v565_v40 }
  0xdb   : > { %v401_v49 = vpop.xlane.xlu2 %400  ;;  %v554_v57 = vadd.f32 1e-05, %v546_v45 }
  0xdc   : > { %v509_v59 = vpop.xlane.xlu1 %508  ;;  %v570_v60 = vsel %vm569_vm7, %v1131_v22, %v566_v50  ;;  %v616_v61 = vmul.f32 %v1133_v29, %v615_v46  ;;  %v647_v46 = vsub.f32 %v1538_v25, %v1634_v54 }
  0xdd   : > { %1134 = vrsqrt.f32 %v554_v57  ;;  %v519_v63 = vadd.f32 %v509_v59, %v477_v47  ;;  %v665_v1 = vmul.f32 %v657_v53, %v570_v60  ;;  %v649_v7 = vmul.f32 %v641_v52, %v570_v60 }
  0xde   : > { %v620_v48 = vsel %vm619_vm9, %v1133_v29, %v616_v61  ;;  %vm577_vm11 = vweird.f32 %v554_v57  ;;  %v658_v29 = vsub.f32 %v1541_v26, %v1626_v30  ;;  %v663_v52 = vsub.f32 %v1552_v31, %v1634_v54 }
  0xdf   : > { %v535_v2 = vmul.f32 0.0078125, %v519_v63  ;;  %1006 = vmatmul.msk.f32.vlgmr.msra.gmra.mxu0 %vm392_vm0, %v665_v1  ;;  %v670_v13 = vmul.f32 %v662_v62, %v620_v48  ;;  %v654_v4 = vmul.f32 %v646_v58, %v620_v48  ;;  %1014 = vmatmul.msk.f32.vlgmr.msra.gmra.mxu1 %vm392_vm0, %v649_v7 }
  0xe1   : > { %v551_v6 = vsub.f32 %v535_v2, %v543_v3  ;;  %1011 = vmatmul.msk.f32.gmra.mxu2 %vm392_vm0, %v670_v13  ;;  %1019 = vmatmul.msk.f32.gmra.mxu3 %vm392_vm0, %v654_v4 }
  0xe2   : > { %v425_v14 = vpop.xlane.xlu0 %424 }
  0xe3   : > { %v440_v51 = vpop.xlane.xlu2 %439  ;;  %v1135_v8 = vpop.eup %1134  ;;  %v559_v9 = vadd.f32 1e-05, %v551_v6  ;;  %v443_v15 = vadd.f32 %v425_v14, %v401_v49 }
  0xe4   : > { %v572_v10 = vmul.f32 %v1135_v8, %v554_v57  ;;  %v416_v11 = vpop.xlane.xlu1 %415  ;;  %vm578_vm10 = vweird.f32 %v1135_v8 }
  0xe5   : > { %1136 = vrsqrt.f32 %v559_v9  ;;  %v1647_v21 = vmul.f32 0.0078125, %v443_v15  ;;  %v448_v32 = vadd.f32 %v440_v51, %v416_v11  ;;  %vm579_vm12 = vmor %vm577_vm11, %vm578_vm10  ;;  %vm627_vm14 = vweird.f32 %v559_v9 }
  0xe6   : > { %v573_v12 = vmul.f32 %v1135_v8, %v572_v10 }
  0xe7   : > { %v539_v35 = vmul.f32 %v1647_v21, %v1647_v21  ;;  %v1655_v40 = vmul.f32 0.0078125, %v448_v32  ;;  %v659_v15 = vsub.f32 %v1572_v42, %v1647_v21 }
  0xe8   : > { %v574_v16 = vmul.f32 0.5, %v573_v12  ;;  %v643_v12 = vsub.f32 %v1563_v37, %v1647_v21 }
  0xe9   : > { %v544_v57 = vmul.f32 %v1655_v40, %v1655_v40  ;;  %v648_v37 = vsub.f32 %v1578_v44, %v1655_v40  ;;  %v664_v42 = vsub.f32 %v1575_v43, %v1655_v40 }
  0xea   : > { %v575_v17 = vsub.f32 1.5, %v574_v16  ;;  %v465_v18 = vpop.xlane.xlu0 %464 }
  0xeb   : > { %v480_v19 = vpop.xlane.xlu2 %479  ;;  %v1137_v20 = vpop.eup %1136 }
  0xec   : > { %v622_v22 = vmul.f32 %v1137_v20, %v559_v9  ;;  %v497_v23 = vpop.xlane.xlu1 %496  ;;  %v576_v27 = vmul.f32 %v1135_v8, %v575_v17  ;;  %vm628_vm13 = vweird.f32 %v1137_v20 }
  0xed   : > { %v515_v0 = vadd.f32 %v497_v23, %v465_v18  ;;  %vm629_vm15 = vmor %vm627_vm14, %vm628_vm13 }
  0xee   : > { %v623_v34 = vmul.f32 %v1137_v20, %v622_v22  ;;  %v580_v5 = vsel %vm579_vm12, %v1135_v8, %v576_v27 }
  0xef   : > { %v531_v33 = vmul.f32 0.0078125, %v515_v0  ;;  %v666_v36 = vmul.f32 %v658_v29, %v580_v5  ;;  %v650_v38 = vmul.f32 %v642_v28, %v580_v5 }
  0xf0   : > { %v624_v39 = vmul.f32 0.5, %v623_v34 }
  0xf1   : > { %v547_v41 = vsub.f32 %v531_v33, %v539_v35  ;;  %1007 = vmatmul.msk.f32.gmra.mxu0 %vm392_vm0, %v666_v36  ;;  %1015 = vmatmul.msk.f32.gmra.mxu1 %vm392_vm0, %v650_v38  ;;  %v1127_v38 = vld [vmem:[%s1730_s4] ss:$0 sm:$0xff] }
  0xf2   : > { %v625_v24 = vsub.f32 1.5, %v624_v39  ;;  %v512_v26 = vpop.xlane.xlu0 %511 }
  0xf3   : > { %v555_v30 = vadd.f32 1e-05, %v547_v41  ;;  %v520_v45 = vadd.f32 %v512_v26, %v480_v19  ;;  %v428_v49 = vpop.xlane.xlu2 %427 }
  0xf4   : > { %v404_v47 = vpop.xlane.xlu1 %403  ;;  %v626_v50 = vmul.f32 %v1137_v20, %v625_v24 }
  0xf5   : > { %1138 = vrsqrt.f32 %v555_v30  ;;  %v536_v53 = vmul.f32 0.0078125, %v520_v45  ;;  %v444_v60 = vadd.f32 %v428_v49, %v404_v47  ;;  %vm587_vm2 = vweird.f32 %v555_v30 }
  0xf6   : > { %v630_v58 = vsel %vm629_vm15, %v1137_v20, %v626_v50 }
  0xf7   : > { %v552_v59 = vsub.f32 %v536_v53, %v544_v57  ;;  %v671_v61 = vmul.f32 %v663_v52, %v630_v58  ;;  %v655_v62 = vmul.f32 %v647_v46, %v630_v58  ;;  %v524_v31 = vmul.f32 0.0078125, %v444_v60 }
  0xf9   : > { %v560_v63 = vadd.f32 1e-05, %v552_v59  ;;  %1012 = vmatmul.msk.f32.gmra.mxu2 %vm392_vm0, %v671_v61  ;;  %1020 = vmatmul.msk.f32.gmra.mxu3 %vm392_vm0, %v655_v62  ;;  %v540_v13 = vmul.f32 %v524_v31, %v524_v31  ;;  %v644_v44 = vsub.f32 %v1601_v56, %v524_v31  ;;  %v660_v43 = vsub.f32 %v1598_v55, %v524_v31 }
  0xfa   : > { %v468_v25 = vpop.xlane.xlu0 %467 }
  0xfb   : > { %v1139_v1 = vpop.eup %1138  ;;  %1140 = vrsqrt.f32 %v560_v63  ;;  %vm637_vm5 = vweird.f32 %v560_v63 }
  0xfc   : > { %v582_v54 = vmul.f32 %v1139_v1, %v555_v30  ;;  %v500_v7 = vpop.xlane.xlu1 %499  ;;  %vm588_vm1 = vweird.f32 %v1139_v1 }
  0xfd   : > { %v516_v48 = vadd.f32 %v500_v7, %v468_v25  ;;  %vm589_vm3 = vmor %vm587_vm2, %vm588_vm1 }
  0xfe   : > { %v583_v2 = vmul.f32 %v1139_v1, %v582_v54 }
  0xff   : > { %v532_v3 = vmul.f32 0.0078125, %v516_v48 }
 0x100   : > { %v584_v4 = vmul.f32 0.5, %v583_v2 }
 0x101   : > { %v1141_v6 = vpop.eup %1140  ;;  %v548_v14 = vsub.f32 %v532_v3, %v540_v13 }
 0x102   : > { %v585_v51 = vsub.f32 1.5, %v584_v4  ;;  %v632_v8 = vmul.f32 %v1141_v6, %v560_v63  ;;  %vm638_vm4 = vweird.f32 %v1141_v6 }
 0x103   : > { %v556_v9 = vadd.f32 1e-05, %v548_v14  ;;  %vm639_vm6 = vmor %vm637_vm5, %vm638_vm4 }
 0x104   : > { %v633_v10 = vmul.f32 %v1141_v6, %v632_v8  ;;  %v586_v11 = vmul.f32 %v1139_v1, %v585_v51 }
 0x105   : > { %1142 = vrsqrt.f32 %v556_v9  ;;  %vm597_vm8 = vweird.f32 %v556_v9 }
 0x106   : > { %v634_v16 = vmul.f32 0.5, %v633_v10  ;;  %v590_v17 = vsel %vm589_vm3, %v1139_v1, %v586_v11 }
 0x107   : > { %v667_v18 = vmul.f32 %v659_v15, %v590_v17  ;;  %v651_v19 = vmul.f32 %v643_v12, %v590_v17 }
 0x108   : > { %v635_v20 = vsub.f32 1.5, %v634_v16 }
 0x109   : > { %1008 = vmatmul.msk.f32.gmra.mxu0 %vm392_vm0, %v667_v18  ;;  %1016 = vmatmul.msk.f32.gmra.mxu1 %vm392_vm0, %v651_v19 }
 0x10a   : > { %v636_v22 = vmul.f32 %v1141_v6, %v635_v20 }
 0x10b   : > { %v1143_v23 = vpop.eup %1142 }
 0x10c   : > { %v592_v21 = vmul.f32 %v1143_v23, %v556_v9  ;;  %v640_v27 = vsel %vm639_vm6, %v1141_v6, %v636_v22  ;;  %vm598_vm7 = vweird.f32 %v1143_v23 }
 0x10d   : > { %v672_v28 = vmul.f32 %v664_v42, %v640_v27  ;;  %v656_v29 = vmul.f32 %v648_v37, %v640_v27  ;;  %vm599_vm9 = vmor %vm597_vm8, %vm598_vm7 }
 0x10e   : > { %v593_v32 = vmul.f32 %v1143_v23, %v592_v21 }
 0x10f   : > { %1013 = vmatmul.msk.f32.gmra.mxu2 %vm392_vm0, %v672_v28  ;;  %1021 = vmatmul.msk.f32.gmra.mxu3 %vm392_vm0, %v656_v29 }
 0x110   : > { %v594_v0 = vmul.f32 0.5, %v593_v32 }
 0x112   : > { %v595_v34 = vsub.f32 1.5, %v594_v0 }
 0x114   : > { %v596_v5 = vmul.f32 %v1143_v23, %v595_v34 }
 0x116   : > { %v600_v33 = vsel %vm599_vm9, %v1143_v23, %v596_v5 }
 0x117   : > { %v668_v35 = vmul.f32 %v660_v43, %v600_v33  ;;  %v652_v36 = vmul.f32 %v644_v44, %v600_v33 }
 0x119   : > { %1009 = vmatmul.msk.f32.gmra.mxu0 %vm392_vm0, %v668_v35  ;;  %1017 = vmatmul.msk.f32.gmra.mxu1 %vm392_vm0, %v652_v36 }
 0x154   : > { %v742_v39 = vpop.f32.mrf.mxu2  ;;  %v807_v56 = vpop.f32.mrf.mxu3 }
 0x155   : > { %v808_v40 = vadd.f32 %v807_v56, %v742_v39 }
 0x157   : > { %v827_v55 = vadd.f32 %v1127_v38, %v808_v40 }
 0x159   : > { %835 = vst.msk [vmem:[%s1690_s13 + $0x20] sm:$0xff] %vm392_vm0, %v827_v55 }
 0x15c   : > { %v730_v41 = vpop.f32.mrf.mxu0  ;;  %v795_v24 = vpop.f32.mrf.mxu1 }
 0x15d   : > { %v796_v26 = vadd.f32 %v795_v24, %v730_v41 }
 0x15f   : > { %v823_v30 = vadd.f32 %v1127_v38, %v796_v26 }
 0x161   : > { %831 = vst.msk [vmem:[%s1690_s13] sm:$0xff] %vm392_vm0, %v823_v30 }
 0x164   : > { %v745_v45 = vpop.f32.mrf.mxu2  ;;  %v810_v46 = vpop.f32.mrf.mxu3 }
 0x165   : > { %v811_v47 = vadd.f32 %v810_v46, %v745_v45 }
 0x167   : > { %v828_v49 = vadd.f32 %v1127_v38, %v811_v47 }
 0x169   : > { %836 = vst.msk [vmem:[%s1690_s13 + $0x28] sm:$0xff] %vm392_vm0, %v828_v49 }
 0x16e   : > { %v733_v50 = vpop.f32.mrf.mxu0  ;;  %v798_v52 = vpop.f32.mrf.mxu1 }
 0x16f   : > { %v799_v53 = vadd.f32 %v798_v52, %v733_v50 }
 0x171   : > { %v824_v57 = vadd.f32 %v1127_v38, %v799_v53 }
 0x173   : > { %832 = vst.msk [vmem:[%s1690_s13 + $0x8] sm:$0xff] %vm392_vm0, %v824_v57 }
 0x17c   : > { %v748_v58 = vpop.f32.mrf.mxu2  ;;  %v813_v59 = vpop.f32.mrf.mxu3 }
 0x17d   : > { %v814_v60 = vadd.f32 %v813_v59, %v748_v58 }
 0x17f   : > { %v829_v61 = vadd.f32 %v1127_v38, %v814_v60 }
 0x181   : > { %837 = vst.msk [vmem:[%s1690_s13 + $0x30] sm:$0xff] %vm392_vm0, %v829_v61 }
 0x186   : > { %v736_v62 = vpop.f32.mrf.mxu0  ;;  %v801_v63 = vpop.f32.mrf.mxu1 }
 0x187   : > { %v802_v25 = vadd.f32 %v801_v63, %v736_v62 }
 0x189   : > { %v825_v1 = vadd.f32 %v1127_v38, %v802_v25 }
 0x18b   : > { %833 = vst.msk [vmem:[%s1690_s13 + $0x10] sm:$0xff] %vm392_vm0, %v825_v1 }
 0x192   : > { %v751_v31 = vpop.f32.mrf.mxu2  ;;  %v816_v54 = vpop.f32.mrf.mxu3 }
 0x193   : > { %v817_v7 = vadd.f32 %v816_v54, %v751_v31 }
 0x195   : > { %v830_v48 = vadd.f32 %v1127_v38, %v817_v7 }
 0x196   : > { %v739_v2 = vpop.f32.mrf.mxu0  ;;  %v804_v3 = vpop.f32.mrf.mxu1 }
 0x197   : > { %838 = vst.msk [vmem:[%s1690_s13 + $0x38] sm:$0xff] %vm392_vm0, %v830_v48  ;;  %v805_v13 = vadd.f32 %v804_v3, %v739_v2 }
 0x199   : > { %v826_v4 = vadd.f32 %v1127_v38, %v805_v13 }
 0x19b   : > { %834 = vst.msk [vmem:[%s1690_s13 + $0x18] sm:$0xff] %vm392_vm0, %v826_v4 }
 0x19c PF: > { %s22_s23 = sadd.s32 1, %s1326_s23   ;;  %s1752_s14 = sld [smem:[#allocation13_spill]] }
 0x19d   : > { %p19_p2 = scmp.ge.s32.totalorder %s22_s23, 4   ;;  %s1753_s18 = smov %s1310_s19 }
 0x19e   : > { %s1754_s19 = smov %s1314_s20  ;;  %s1755_s20 = smov %s1444_s6 }
 0x19f   : > { %s1756_s21 = smov %s1322_s22  ;;  %21 = sbr.rel (!%p19_p2) target bundleno = 11 (0xb), region = 106 }
 0x1a2   : > { %s1757_s22 = smov %s1752_s14 }
 0x1a4   :  { %867 = vsyncpa [#allocation3], 1 }
 0x1a5   :  { %869 = vsyncpa [#allocation3 + $0x1], 1 }
 0x1a6   :  { %870 = vsyncpa [#allocation5], 1 }
 0x1a7   :  { %872 = vsyncpa [#allocation5 + $0x1], 1 }
 0x1a8   :  { %873 = vsyncpa [#allocation8], 1 }

</bundles_post_ra>
